<compile_context>
chip_gen: v5e
topology: v5e:2x2
jax: 0.10.0
libtpu: 0.0.40
codegen_flags: <defaults>
</compile_context>

<pallas_src>
import math
import functools

import jax
import jax.numpy as jnp
from jax.experimental import pallas as pl
from jax.experimental.pallas import tpu as pltpu


_MAX_LANE_BLOCK = 32768   # lane width per block (multiple of 128)
_MAX_ROW_BLOCK = 32       # sublane rows per block; 32*32768*4B = 4 MiB f32 per input block
_NUM_SHARDS = 2           # leading 'parallel' grid axis (both TensorCores on v7x)


def _choose_tiling(n):
    """Exact (no padding) tiling: returns (row_block, lane_block, rows_total) with
       lane_block % 128 == 0, lane_block | n, lane_block <= _MAX_LANE_BLOCK, and
       row_block | rows_total with row_block a multiple of 8 (or the full row dim).
       Returns None when no such tiling exists (caller falls back to plain JAX)."""
    if n <= 0 or n % 128 != 0:
        return None
    m = n // 128
    lane_mult = 1
    for cand in range(min(m, _MAX_LANE_BLOCK // 128), 0, -1):
        if m % cand == 0:
            lane_mult = cand
            break
    lane_block = 128 * lane_mult
    rows_total = n // lane_block
    if rows_total <= _MAX_ROW_BLOCK:
        row_block = rows_total            # block spans the full sublane dim (always legal)
    else:
        row_block = 0
        for cand in range(_MAX_ROW_BLOCK, 0, -8):
            if rows_total % cand == 0:
                row_block = cand
                break
        if row_block == 0:
            return None
    return row_block, lane_block, rows_total


def _dsds_kernel(density_ref, xhat_ref, out_ref, acc_ref, *, target):
    # Grid axis 1 is the reduction axis within a shard.
    s = pl.program_id(1)

    @pl.when(s == 0)
    def _init():
        acc_ref[...] = jnp.zeros_like(acc_ref)

    d = density_ref[...].astype(jnp.float32)     # (row_block, lane_block)
    xh = xhat_ref[...]                           # native dtype; only the sign matters

    # xhat < 0 -> 'empty' branch (density); xhat >= 0 (incl. NaN) -> 'full' branch
    # (clamp(target - density, min=0)), matching torch.where(xhat < 0, -1, 1).
    acc_ref[...] += jnp.where(xh < 0, d, jnp.maximum(target - d, 0.0))

    @pl.when(s == pl.num_programs(1) - 1)
    def _finalize():
        # Collapse the block-shaped accumulator once per shard (XLU slot has full
        # slack in this mem-bound kernel) and emit a lane-dense tiny partial.
        out_ref[0] = jnp.sum(acc_ref[...], axis=0, keepdims=True)


def dsds_loss_pallas(density, xhat, singlestep_target=1.0):
    """density: [B, H, W] (or [B, D, H, W]); xhat: model output shaped like density.unsqueeze(1)."""
    d4 = jnp.expand_dims(density, 1)             # torch .unsqueeze(1)
    assert xhat.shape == d4.shape, (xhat.shape, d4.shape)
    n = int(math.prod(d4.shape))                 # denominator uses the REAL size
    denom = float(n)

    tiling = _choose_tiling(n)
    if tiling is None:
        # TODO(synk): element counts with no (8,128)-friendly exact factorization use
        # this plain-JAX path instead of padding-copies of both HBM streams.
        d32 = d4.astype(jnp.float32)
        contrib = jnp.where(xhat < 0, d32, jnp.maximum(singlestep_target - d32, 0.0))
        return jnp.sum(contrib) / denom

    row_block, lane_block, rows_total = tiling
    steps_total = rows_total // row_block
    num_shards = _NUM_SHARDS if (steps_total >= _NUM_SHARDS and
                                 steps_total % _NUM_SHARDS == 0) else 1
    steps_per_shard = steps_total // num_shards

    # Zero-copy (bitcast) reshapes of the original contiguous buffers.  Inputs stay
    # in their producer dtype: keep density / xhat in bf16 upstream when available.
    d2 = d4.reshape(rows_total, lane_block)
    x2 = xhat.reshape(rows_total, lane_block)

    kernel = functools.partial(_dsds_kernel, target=float(singlestep_target))

    in_block_bytes = row_block * lane_block * (d2.dtype.itemsize + x2.dtype.itemsize)
    acc_bytes = row_block * lane_block * 4
    out_bytes = num_shards * lane_block * 4
    # 2 pipeline buffers per input + resident f32 accumulator + tiny output, with headroom;
    # capped at 48 MiB (fits v7x's 64 MiB per-TC VMEM; v5e/v6e have 128 MiB physical).
    vmem_limit = int(min(max(2 * (2 * in_block_bytes + acc_bytes + out_bytes), 32 << 20),
                         48 << 20))

    partials = pl.pallas_call(
        kernel,
        out_shape=jax.ShapeDtypeStruct((num_shards, 1, lane_block), jnp.float32),
        grid_spec=pltpu.PrefetchScalarGridSpec(
            num_scalar_prefetch=0,
            grid=(num_shards, steps_per_shard),
            in_specs=[
                pl.BlockSpec((row_block, lane_block),
                             lambda c, s: (c * steps_per_shard + s, 0)),
                pl.BlockSpec((row_block, lane_block),
                             lambda c, s: (c * steps_per_shard + s, 0)),
            ],
            # One tiny lane-dense partial per shard, written only on the last step.
            out_specs=pl.BlockSpec((1, 1, lane_block), lambda c, s: (c, 0, 0)),
            scratch_shapes=[pltpu.VMEM((row_block, lane_block), jnp.float32)],
        ),
        compiler_params=pltpu.CompilerParams(
            # TODO(synk): verify via xprof that 'parallel' actually shards across both
            # TensorCores on v7x; switch this axis to pltpu.CORE_PARALLEL if it does not.
            dimension_semantics=("parallel", "arbitrary"),
            vmem_limit_bytes=vmem_limit,
        ),
        cost_estimate=pl.CostEstimate(
            flops=4 * n, transcendentals=0,
            bytes_accessed=(d2.size * d2.dtype.itemsize
                            + x2.size * x2.dtype.itemsize
                            + num_shards * lane_block * 4)),
    )(d2, x2)

    # Only a tiny (num_shards, 1, lane_block) combine + normalization remains outside.
    return jnp.sum(partials) / denom


class NoiseScheduler:
    """Deterministic stand-in for the diffusers scheduler used in __init__."""

    def __init__(self, num_train_timesteps=1000):
        self.num_train_timesteps = num_train_timesteps
        betas = jnp.linspace(1e-4, 0.02, num_train_timesteps, dtype=jnp.float32)
        self.alphas_cumprod = jnp.cumprod(1.0 - betas)


class DSDSLossPallas:
    """Mirrors DSDSLoss.__init__ / forward for the default 'loss_dsds_unguided' path."""

    def __init__(self, noise_scheduler, diffusion_loss='loss_dsds_unguided',
                 guidance_weight=1.0, anneal='random'):
        assert diffusion_loss == 'loss_dsds_unguided'
        self.diffusion_loss = diffusion_loss
        self.guidance_weight = guidance_weight
        self.anneal = anneal
        self.noise_scheduler = noise_scheduler
        self.num_train_timesteps = noise_scheduler.num_train_timesteps
        self.min_step = int(self.num_train_timesteps * 0.02)
        self.max_step = int(self.num_train_timesteps * 0.98)
        # alphas only feed the grad_sds_* paths; unused by loss_dsds but kept for fidelity.
        self.alphas = noise_scheduler.alphas_cumprod

    def forward(self, x, xhat, timesteps=None, scale=None, multistep_sds_steps=1):
        # TODO(synk): `model.single_step_reverse_process(sample, scale, starting_t)` is an
        # external frozen diffusion-model call (no clean Pallas equivalent); its output
        # `xhat` is taken as an input here. `timesteps`/`scale` only feed that model call.
        return dsds_loss_pallas(x, xhat, singlestep_target=1.0)

    __call__ = forward


if __name__ == "__main__":
    key = jax.random.PRNGKey(0)
    k1, k2 = jax.random.split(key)

    B, H, W = 2, 16, 16
    density = jax.random.uniform(k1, (B, H, W), dtype=jnp.float32)
    # Deterministic surrogate for the frozen model's single-step reverse output.
    xhat = jax.random.normal(k2, (B, 1, H, W), dtype=jnp.float32)

    scheduler = NoiseScheduler(num_train_timesteps=1000)
    loss_mod = DSDSLossPallas(scheduler)

    starting_t = int(scheduler.num_train_timesteps * 0.5)   # only used by the model call
    loss = loss_mod(density, xhat, timesteps=starting_t, scale=None)
    loss = jax.block_until_ready(loss)

    # Pure-JAX reference of the PyTorch semantics.
    xq = jnp.where(xhat < 0, -1.0, 1.0)
    mask_empty = (xq == -1.0)
    mask_full = (xq == 1.0)
    d4 = density[:, None, :, :]
    ref = (d4 * mask_empty).sum() + (jnp.clip(1.0 - d4, 0.0, None) * mask_full).sum()
    ref = ref / math.prod(d4.shape)

    assert jnp.allclose(loss, ref, rtol=1e-5, atol=1e-5), (loss, ref)
    print("KERNEL_OK")
</pallas_src>

<mosaic_0001>
module attributes {stable_mosaic.version = 11 : i64} {
  func.func @_dsds_kernel(%arg0: i32, %arg1: i32, %arg2: memref<1x512xf32, #tpu.memory_space<vmem>>, %arg3: memref<1x512xf32, #tpu.memory_space<vmem>>, %arg4: memref<1x1x512xf32, #tpu.memory_space<vmem>>, %arg5: memref<1x512xf32, #tpu.memory_space<vmem>>) attributes {dimension_semantics = [#tpu.dimension_semantics<parallel>, #tpu.dimension_semantics<arbitrary>], iteration_bounds = array<i64: 1, 1>, scalar_prefetch = 0 : i64, scratch_operands = 1 : i64, tpu.core_type = #tpu.core_type<tc>, window_params = [{transform_indices = @transform_0, window_bounds = array<i64: 1, 512>}, {transform_indices = @transform_1, window_bounds = array<i64: 1, 512>}, {transform_indices = @transform_2, window_bounds = array<i64: 1, 1, 512>}]} {
    %c0_i32 = arith.constant 0 : i32
    %0 = arith.cmpi eq, %arg1, %c0_i32 : i32
    %1 = arith.extui %0 : i1 to i32
    %c0_i32_0 = arith.constant 0 : i32
    %2 = arith.cmpi ne, %1, %c0_i32_0 : i32
    scf.if %2 {
      %cst_12 = arith.constant 0.000000e+00 : f32
      %18 = vector.broadcast %cst_12 : f32 to vector<1x512xf32>
      %c0_13 = arith.constant 0 : index
      %c0_14 = arith.constant 0 : index
      %19 = vector.load %arg5[%c0_13, %c0_14] : memref<1x512xf32, #tpu.memory_space<vmem>>, vector<1x512xf32>
      tpu.vector_store %arg5[%c0_13, %c0_14], %18 {strides = array<i32>} : memref<1x512xf32, #tpu.memory_space<vmem>>, vector<1x512xf32>,
    } else {
    }
    %c0 = arith.constant 0 : index
    %c0_1 = arith.constant 0 : index
    %3 = vector.load %arg2[%c0, %c0_1] : memref<1x512xf32, #tpu.memory_space<vmem>>, vector<1x512xf32>
    %c0_2 = arith.constant 0 : index
    %c0_3 = arith.constant 0 : index
    %4 = vector.load %arg3[%c0_2, %c0_3] : memref<1x512xf32, #tpu.memory_space<vmem>>, vector<1x512xf32>
    %c0_4 = arith.constant 0 : index
    %c0_5 = arith.constant 0 : index
    %5 = vector.load %arg5[%c0_4, %c0_5] : memref<1x512xf32, #tpu.memory_space<vmem>>, vector<1x512xf32>
    %cst = arith.constant 0.000000e+00 : f32
    %6 = vector.broadcast %cst : f32 to vector<1x512xf32>
    %7 = arith.cmpf olt, %4, %6 : vector<1x512xf32>
    %cst_6 = arith.constant 1.000000e+00 : f32
    %8 = vector.broadcast %cst_6 : f32 to vector<1x512xf32>
    %9 = arith.subf %8, %3 : vector<1x512xf32>
    %cst_7 = arith.constant 0.000000e+00 : f32
    %10 = vector.broadcast %cst_7 : f32 to vector<1x512xf32>
    %11 = arith.maximumf %9, %10 : vector<1x512xf32>
    %12 = arith.select %7, %3, %11 : vector<1x512xi1>, vector<1x512xf32>
    %13 = arith.addf %5, %12 : vector<1x512xf32>
    %c0_8 = arith.constant 0 : index
    %c0_9 = arith.constant 0 : index
    %14 = vector.load %arg5[%c0_8, %c0_9] : memref<1x512xf32, #tpu.memory_space<vmem>>, vector<1x512xf32>
    tpu.vector_store %arg5[%c0_8, %c0_9], %13 {strides = array<i32>} : memref<1x512xf32, #tpu.memory_space<vmem>>, vector<1x512xf32>,
    %c0_i32_10 = arith.constant 0 : i32
    %15 = arith.cmpi eq, %arg1, %c0_i32_10 : i32
    %16 = arith.extui %15 : i1 to i32
    %c0_i32_11 = arith.constant 0 : i32
    %17 = arith.cmpi ne, %16, %c0_i32_11 : i32
    scf.if %17 {
      %c0_12 = arith.constant 0 : index
      %c0_13 = arith.constant 0 : index
      %18 = vector.load %arg5[%c0_12, %c0_13] : memref<1x512xf32, #tpu.memory_space<vmem>>, vector<1x512xf32>
      %cst_14 = arith.constant dense<0.000000e+00> : vector<512xf32>
      %19 = vector.multi_reduction <add>, %18, %cst_14 [0] : vector<1x512xf32> to vector<512xf32>
      %20 = vector.shape_cast %19 : vector<512xf32> to vector<1x512xf32>
      %c0_15 = arith.constant 0 : index
      %c0_16 = arith.constant 0 : index
      %c0_17 = arith.constant 0 : index
      %21 = vector.load %arg4[%c0_15, %c0_16, %c0_17] : memref<1x1x512xf32, #tpu.memory_space<vmem>>, vector<1x1x512xf32>
      %22 = vector.shape_cast %21 : vector<1x1x512xf32> to vector<1x512xf32>
      %23 = vector.shape_cast %20 : vector<1x512xf32> to vector<1x1x512xf32>
      tpu.vector_store %arg4[%c0_15, %c0_16, %c0_17], %23 {strides = array<i32>} : memref<1x1x512xf32, #tpu.memory_space<vmem>>, vector<1x1x512xf32>,
    } else {
    }
    return
  }
  func.func @transform_0(%arg0: i32, %arg1: i32) -> (i32, i32) {
    %c1_i32 = arith.constant 1 : i32
    %0 = arith.muli %arg0, %c1_i32 : i32
    %1 = arith.addi %0, %arg1 : i32
    %c0_i32 = arith.constant 0 : i32
    %c0_i32_0 = arith.constant 0 : i32
    return %1, %c0_i32 : i32, i32
  }
  func.func @transform_1(%arg0: i32, %arg1: i32) -> (i32, i32) {
    %c1_i32 = arith.constant 1 : i32
    %0 = arith.muli %arg0, %c1_i32 : i32
    %1 = arith.addi %0, %arg1 : i32
    %c0_i32 = arith.constant 0 : i32
    %c0_i32_0 = arith.constant 0 : i32
    return %1, %c0_i32 : i32, i32
  }
  func.func @transform_2(%arg0: i32, %arg1: i32) -> (i32, i32, i32) {
    %c0_i32 = arith.constant 0 : i32
    %c0_i32_0 = arith.constant 0 : i32
    %c0_i32_1 = arith.constant 0 : i32
    return %arg0, %c0_i32, %c0_i32_0 : i32, i32, i32
  }
}

</mosaic_0001>

<bundles_post_ra>
// kernel: tpu_custom_call.1
= control target key start
LH: loop header
LB: loop body
LE: loop exit
PB: predicated region body
PF: predicated region fallthrough
CT: control target
= control target key end

     0   :  { %7 = vsyncpa [#allocation4], 0  ;;  %s214_s0 = inlined_call_operand.hbm [shape: f32[1,512], index: 0, kind: input, shape index: {}]   ;;  %s215_s1 = inlined_call_operand.hbm [shape: f32[1,512], index: 1, kind: input, shape index: {}]   ;;  %s216_s2 = inlined_call_operand.hbm [shape: f32[1,1,512], index: 2, kind: output, shape index: {}]  }
   0x1   :  { %8 = vsyncpa [#allocation7], 0 }
   0x2   :  { %9 = vsyncpa [#allocation5], 0  ;;  %s18_s11 = sshll.u32 %s214_s0, 4  ;;  %s176_s12 = smov [#allocation3]   ;;  %s19_s11 = int_to_ptr.hbm [resolvable:$true] %s18_s11 }
   0x3   :  { %s20_s13 = sshll.u32 %s176_s12, 4  ;;  %s32_s16 = sshll.u32 %s215_s1, 4  ;;  %s21_s13 = int_to_ptr.vmem [resolvable:$true] %s20_s13  ;;  %s33_s16 = int_to_ptr.hbm [resolvable:$true] %s32_s16 }
   0x4   :  { %23 = dma.hbm_to_vmem [thread:$0]  %s19_s11, 64, %s21_s13, [#allocation4]  }
   0x5   :  { %s177_s17 = smov [#allocation6]  }
   0x6   :  { %s34_s18 = sshll.u32 %s177_s17, 4  ;;  %s35_s18 = int_to_ptr.vmem [resolvable:$true] %s34_s18 }
   0x7   :  { %37 = dma.hbm_to_vmem [thread:$0]  %s33_s16, 64, %s35_s18, [#allocation7]  }
   0x8   :  { %170 = dma.done.wait [#allocation4], 64  }
   0x9   :  { %171 = vsyncadd [#allocation4], 4294967232 }
   0xa   :  { %172 = dma.done.wait [#allocation7], 64  }
   0xb   :  { %173 = vsyncadd [#allocation7], 4294967232  ;;  %v52_v0 = vlaneseq  ;;  %v178_v2 = vmov 0.0   ;;  %v57_v3 = vld [vmem:[#allocation3] sm:$0xf]  ;;  %s179_s0 = smov [#allocation8]  }
   0xc   :  { %v58_v4 = vld [vmem:[#allocation6] sm:$0xf]  ;;  %v61_v5 = vsub.f32 1.0, %v57_v3  ;;  %s81_s1 = sshll.u32 %s179_s0, 4  ;;  %s83_s21 = sshll.u32 %s216_s2, 4  ;;  %s82_s1 = int_to_ptr.vmem [resolvable:$true] %s81_s1  ;;  %s84_s21 = int_to_ptr.hbm [resolvable:$true] %s83_s21 }
   0xd   :  { %vm201_vm0 = vcmp.lt.s32.totalorder %v52_v0, 512  ;;  %vm60_vm1 = vcmp.lt.f32.partialorder %v58_v4, 0.0 }
   0xe   :  { %56 = vst.msk [vmem:[#allocation2] sm:$0xf] %vm201_vm0, %v178_v2  ;;  %v62_v7 = vmax.f32 %v61_v5, 0.0 }
  0x10   :  { %v63_v8 = vsel %vm60_vm1, %v57_v3, %v62_v7 }
  0x15   :  { %v59_v6 = vld [vmem:[#allocation2] sm:$0xf] }
  0x16   :  { %v64_v9 = vadd.f32 %v63_v8, %v59_v6 }
  0x18   :  { %69 = vst.msk [vmem:[#allocation2] sm:$0xf] %vm201_vm0, %v64_v9 }
  0x1f   :  { %v73_v10 = vld [vmem:[#allocation2] sm:$0xf] }
  0x20   :  { %75 = vst.msk [vmem:[#allocation8] sm:$0xf] %vm201_vm0, %v73_v10 }
  0x21   :  { %86 = dma.vmem_to_hbm [thread:$0]  %s82_s1, 64, %s84_s21, [#allocation5]  }
  0x22   :  { %174 = dma.done.wait [#allocation5], 64  }
  0x23   :  { %175 = vsyncadd [#allocation5], 4294967232 }
  0x24   :  { %91 = vsyncpa [#allocation4], 1 }
  0x25   :  { %92 = vsyncpa [#allocation7], 1 }
  0x26   :  { %93 = vsyncpa [#allocation5], 1 }

</bundles_post_ra>
